<compile_context>
chip_gen: v5e
topology: v5e:2x2
jax: 0.10.0
libtpu: 0.0.40
codegen_flags: <defaults>
</compile_context>

<pallas_src>
import functools
import math

import jax
import jax.numpy as jnp
from jax import lax
from jax.experimental import pallas as pl
from jax.experimental.pallas import tpu as pltpu


def _round_up(x, m):
    return (x + m - 1) // m * m


_SINGLE_TILE_M = 256   # above this, tile M (>=2 pipeline steps, v7x megacore)
_FUSED_BN_MAX_M = 2048  # single-tile fused conv+BN cap (VMEM-safe everywhere)
_BN_EPS = 1e-5


# ----------------------------------------------------------------------------
# Pallas kernel 1: MXU matmul (bf16 in, f32 accumulate) + bias + activation,
# bf16 (or f32) store.  Shared by the strided convs, the final conv, and the
# fused 4-parity deconvolution (where BlockSpecs squeeze a leading grid dim).
# ----------------------------------------------------------------------------
def _mm_bias_act_kernel(a_ref, w_ref, b_ref, o_ref, *, act):
    acc = jnp.dot(a_ref[...], w_ref[...], preferred_element_type=jnp.float32)
    r = acc + b_ref[...]
    if act == "relu":
        r = jnp.maximum(r, 0.0)
    elif act == "tanh":
        r = jnp.tanh(r)
    o_ref[...] = r.astype(o_ref.dtype)


# ----------------------------------------------------------------------------
# Pallas kernel 2: fused conv (matmul) + training-mode BatchNorm (+ReLU or
# +residual).  Per-channel mean and shifted variance are reduced in-kernel from
# the f32 accumulator; the conv bias is mathematically absorbed by BN and is
# therefore not an input at all.
# ----------------------------------------------------------------------------
def _conv_bn_kernel(a_ref, w_ref, g_ref, be_ref, o_ref, *, inv_m, eps, relu):
    acc = jnp.dot(a_ref[...], w_ref[...], preferred_element_type=jnp.float32)
    mean = jnp.sum(acc, axis=0, keepdims=True) * inv_m
    d = acc - mean
    var = jnp.sum(d * d, axis=0, keepdims=True) * inv_m   # shifted (stable) var
    scale = g_ref[...] * lax.rsqrt(var + eps)
    y = d * scale + be_ref[...]
    if relu:
        y = jnp.maximum(y, 0.0)
    o_ref[...] = y.astype(o_ref.dtype)


def _conv_bn_res_kernel(a_ref, w_ref, g_ref, be_ref, r_ref, o_ref, *, inv_m, eps):
    acc = jnp.dot(a_ref[...], w_ref[...], preferred_element_type=jnp.float32)
    mean = jnp.sum(acc, axis=0, keepdims=True) * inv_m
    d = acc - mean
    var = jnp.sum(d * d, axis=0, keepdims=True) * inv_m
    scale = g_ref[...] * lax.rsqrt(var + eps)
    y = d * scale + be_ref[...] + r_ref[...].astype(jnp.float32)
    o_ref[...] = y.astype(o_ref.dtype)


# ----------------------------------------------------------------------------
# Patch / weight glue (XLA).  K padding is folded into the concat so no extra
# full-matrix pad copy is generated; everything is bf16.
# ----------------------------------------------------------------------------
def _extract_patches(x, k, stride, pad):
    """x: (N,H,W,C) -> ((N*Ho*Wo, Kp) bf16, Ho, Wo); Kp = round_up(k*k*C, 128)."""
    if pad:
        x = jnp.pad(x, ((0, 0), (pad, pad), (pad, pad), (0, 0)))
    x = x.astype(jnp.bfloat16)
    N, H, W, C = x.shape
    Ho = (H - k) // stride + 1
    Wo = (W - k) // stride + 1
    pieces = []
    for ki in range(k):
        for kj in range(k):
            pieces.append(x[:, ki:ki + stride * Ho:stride,
                            kj:kj + stride * Wo:stride, :])
    K = k * k * C
    Kp = _round_up(K, 128)
    if Kp != K:
        pieces.append(jnp.zeros((N, Ho, Wo, Kp - K), jnp.bfloat16))
    patches = jnp.concatenate(pieces, axis=-1)
    return patches.reshape(N * Ho * Wo, Kp), Ho, Wo


def _conv_weight_matrix(w_oihw, Kp):
    cout, cin, kh, kw = w_oihw.shape
    w = jnp.transpose(w_oihw, (2, 3, 1, 0)).reshape(kh * kw * cin, cout)
    if Kp != kh * kw * cin:
        w = jnp.pad(w, ((0, Kp - kh * kw * cin), (0, 0)))
    return w.astype(jnp.bfloat16)


# ----------------------------------------------------------------------------
# Matmul wrapper (strided convs, final conv, deconv reuses the kernel directly)
# ----------------------------------------------------------------------------
def matmul_bias_act(a, w_kp_n, bias, act="none", out_dtype=jnp.bfloat16):
    M, Kp = a.shape
    Kp2, N = w_kp_n.shape
    assert Kp == Kp2 and Kp % 128 == 0
    b_row = bias.astype(jnp.float32).reshape(1, N)

    if M <= _SINGLE_TILE_M:
        tm, Mp, a_p = M, M, a
    else:
        tm = _SINGLE_TILE_M                      # >=2 grid steps: pipelining +
        Mp = _round_up(M, tm)                    # v7x 2-TC split on "parallel"
        a_p = a if Mp == M else jnp.pad(a, ((0, Mp - M), (0, 0)))

    out = pl.pallas_call(
        functools.partial(_mm_bias_act_kernel, act=act),
        out_shape=jax.ShapeDtypeStruct((Mp, N), out_dtype),
        grid=(Mp // tm,),
        in_specs=[pl.BlockSpec((tm, Kp), lambda i: (i, 0)),
                  pl.BlockSpec((Kp, N), lambda i: (0, 0)),
                  pl.BlockSpec((1, N), lambda i: (0, 0))],
        out_specs=pl.BlockSpec((tm, N), lambda i: (i, 0)),
        compiler_params=pltpu.CompilerParams(
            dimension_semantics=("parallel",)),
    )(a_p, w_kp_n, b_row)
    return out if Mp == M else out[:M]


def conv2d(x, w_oihw, bias, stride, pad, act="none", out_dtype=jnp.bfloat16):
    cout = w_oihw.shape[0]
    n = x.shape[0]
    patches, Ho, Wo = _extract_patches(x, w_oihw.shape[2], stride, pad)
    w_mat = _conv_weight_matrix(w_oihw, patches.shape[1])
    out = matmul_bias_act(patches, w_mat, bias, act=act, out_dtype=out_dtype)
    return out.reshape(n, Ho, Wo, cout)


# ----------------------------------------------------------------------------
# Fused 3x3 conv + BatchNorm (+ReLU / +residual) for the ResBlocks
# ----------------------------------------------------------------------------
def conv_bn(x, w_oihw, gamma, beta, relu=False, residual=None, eps=_BN_EPS):
    cout = w_oihw.shape[0]
    N, H, W, _ = x.shape
    patches, Ho, Wo = _extract_patches(x, 3, 1, 1)
    M, Kp = patches.shape
    w_mat = _conv_weight_matrix(w_oihw, Kp)
    g_row = gamma.astype(jnp.float32).reshape(1, cout)
    be_row = beta.astype(jnp.float32).reshape(1, cout)

    if M <= _FUSED_BN_MAX_M:
        in_specs = [pl.BlockSpec((M, Kp), lambda i: (0, 0)),
                    pl.BlockSpec((Kp, cout), lambda i: (0, 0)),
                    pl.BlockSpec((1, cout), lambda i: (0, 0)),
                    pl.BlockSpec((1, cout), lambda i: (0, 0))]
        args = [patches, w_mat, g_row, be_row]
        if residual is None:
            kern = functools.partial(_conv_bn_kernel,
                                     inv_m=1.0 / M, eps=eps, relu=relu)
        else:
            kern = functools.partial(_conv_bn_res_kernel, inv_m=1.0 / M, eps=eps)
            in_specs.append(pl.BlockSpec((M, cout), lambda i: (0, 0)))
            args.append(residual.reshape(M, cout).astype(jnp.bfloat16))
        out = pl.pallas_call(
            kern,
            out_shape=jax.ShapeDtypeStruct((M, cout), jnp.bfloat16),
            grid=(1,),
            in_specs=in_specs,
            out_specs=pl.BlockSpec((M, cout), lambda i: (0, 0)),
        )(*args)
        return out.reshape(N, Ho, Wo, cout)

    # TODO(synk): for very large M, fuse stats via per-M-tile partial sums
    # written to a (num_tiles, C) output under a "parallel" grid (v7x megacore)
    # instead of this plain-JAX reduction fallback.
    z = matmul_bias_act(patches, w_mat, jnp.zeros((cout,), jnp.float32),
                        act="none", out_dtype=jnp.float32)
    mean = jnp.mean(z, axis=0)
    var = jnp.mean(jnp.square(z - mean), axis=0)
    y = (z - mean) * (gamma * lax.rsqrt(var + eps)) + beta
    if relu:
        y = jnp.maximum(y, 0.0)
    if residual is not None:
        y = y + residual.reshape(M, cout).astype(jnp.float32)
    return y.astype(jnp.bfloat16).reshape(N, Ho, Wo, cout)


def resblock(x, p):
    h = conv_bn(x, p["w1"], p["g1"], p["be1"], relu=True)
    h = conv_bn(h, p["w2"], p["g2"], p["be2"], relu=False, residual=x)
    return h


# ----------------------------------------------------------------------------
# ConvTranspose2d(k=4, s=2, p=1): sub-pixel decomposition into 4 dense 2x2
# stride-1 sub-convolutions, run as ONE pallas_call with a parity grid axis.
# ----------------------------------------------------------------------------
def conv_transpose2d(x, w_iohw, bias, act="relu"):
    cin, cout, k, _ = w_iohw.shape
    assert k == 4
    N, H, W, _ = x.shape
    xpad = jnp.pad(x, ((0, 0), (1, 1), (1, 1), (0, 0))).astype(jnp.bfloat16)

    K = 4 * cin
    Kp = _round_up(K, 128)
    M = N * H * W

    def tap_slice(r):  # kernel taps feeding output parity r: r=0->(3,1), r=1->(2,0)
        return slice(3, None, -2) if r == 0 else slice(2, None, -2)

    a_parts, w_parts = [], []
    for rh in (0, 1):
        for rw in (0, 1):
            pieces = [xpad[:, rh + di:rh + di + H, rw + dj:rw + dj + W, :]
                      for di in (0, 1) for dj in (0, 1)]
            if Kp != K:
                pieces.append(jnp.zeros((N, H, W, Kp - K), jnp.bfloat16))
            a_parts.append(jnp.concatenate(pieces, axis=-1).reshape(M, Kp))
            w_sub = w_iohw[:, :, tap_slice(rh), tap_slice(rw)]     # (cin,cout,2,2)
            w_mat = jnp.transpose(w_sub, (2, 3, 0, 1)).reshape(K, cout)
            if Kp != K:
                w_mat = jnp.pad(w_mat, ((0, Kp - K), (0, 0)))
            w_parts.append(w_mat.astype(jnp.bfloat16))

    a4 = jnp.stack(a_parts)                          # (4, M, Kp)
    w4 = jnp.stack(w_parts)                          # (4, Kp, cout)
    b_row = bias.astype(jnp.float32).reshape(1, cout)

    out4 = pl.pallas_call(
        functools.partial(_mm_bias_act_kernel, act=act),
        out_shape=jax.ShapeDtypeStruct((4, M, cout), jnp.bfloat16),
        grid=(4,),
        in_specs=[pl.BlockSpec((None, M, Kp), lambda p: (p, 0, 0)),
                  pl.BlockSpec((None, Kp, cout), lambda p: (p, 0, 0)),
                  pl.BlockSpec((1, cout), lambda p: (0, 0))],
        out_specs=pl.BlockSpec((None, M, cout), lambda p: (p, 0, 0)),
        compiler_params=pltpu.CompilerParams(
            dimension_semantics=("parallel",)),
    )(a4, w4, b_row)
    # TODO(synk): also tile M here for large images (each parity currently holds
    # its full per-parity activation as one VMEM block).

    # sub-pixel interleave: (rh, rw, N, H, W, C) -> (N, 2H, 2W, C)
    y = out4.reshape(2, 2, N, H, W, cout)
    y = jnp.transpose(y, (2, 3, 0, 4, 1, 5)).reshape(N, 2 * H, 2 * W, cout)
    return y


# ----------------------------------------------------------------------------
# Parameter init (deterministic, PyTorch-like uniform bounds)
# ----------------------------------------------------------------------------
def _conv_params(key, cin, cout, k):
    k1, k2 = jax.random.split(key)
    bound = 1.0 / math.sqrt(cin * k * k)
    w = jax.random.uniform(k1, (cout, cin, k, k), jnp.float32, -bound, bound)
    b = jax.random.uniform(k2, (cout,), jnp.float32, -bound, bound)
    return w, b


def _convT_params(key, cin, cout, k):
    k1, k2 = jax.random.split(key)
    bound = 1.0 / math.sqrt(cin * k * k)
    w = jax.random.uniform(k1, (cin, cout, k, k), jnp.float32, -bound, bound)
    b = jax.random.uniform(k2, (cout,), jnp.float32, -bound, bound)
    return w, b


def _resblock_params(key, c):
    k1, k2 = jax.random.split(key)
    w1, b1 = _conv_params(k1, c, c, 3)
    w2, b2 = _conv_params(k2, c, c, 3)
    # b1/b2 are kept for parity with PyTorch but are mathematically absorbed by
    # the (training-mode) BatchNorm that follows each conv, so they are unused.
    return {"w1": w1, "b1": b1, "g1": jnp.ones((c,), jnp.float32),
            "be1": jnp.zeros((c,), jnp.float32),
            "w2": w2, "b2": b2, "g2": jnp.ones((c,), jnp.float32),
            "be2": jnp.zeros((c,), jnp.float32)}


def init_generator_params(key):
    ks = jax.random.split(key, 11)
    return {
        "e1": _conv_params(ks[0], 3, 64, 4),
        "r1": _resblock_params(ks[1], 64),
        "e2": _conv_params(ks[2], 64, 128, 4),
        "r2": _resblock_params(ks[3], 128),
        "e3": _conv_params(ks[4], 128, 256, 4),
        "r3": _resblock_params(ks[5], 256),
        "d1": _convT_params(ks[6], 256, 128, 4),
        "r4": _resblock_params(ks[7], 128),
        "d2": _convT_params(ks[8], 128, 64, 4),
        "r5": _resblock_params(ks[9], 64),
        "d3": _convT_params(ks[10], 64, 32, 4),
        "out": _conv_params(jax.random.fold_in(key, 99), 32, 3, 3),
    }


# ----------------------------------------------------------------------------
# Full Generator forward
# ----------------------------------------------------------------------------
@jax.jit
def generator_forward(params, x_nchw):
    p = params
    x = jnp.transpose(x_nchw, (0, 2, 3, 1))                      # NCHW -> NHWC
    # encoder
    x = conv2d(x, *p["e1"], stride=2, pad=1, act="relu")
    x = resblock(x, p["r1"])
    x = conv2d(x, *p["e2"], stride=2, pad=1, act="relu")
    x = resblock(x, p["r2"])
    x = conv2d(x, *p["e3"], stride=2, pad=1, act="relu")
    x = resblock(x, p["r3"])
    # decoder
    x = conv_transpose2d(x, *p["d1"], act="relu")
    x = resblock(x, p["r4"])
    x = conv_transpose2d(x, *p["d2"], act="relu")
    x = resblock(x, p["r5"])
    x = conv_transpose2d(x, *p["d3"], act="relu")
    x = conv2d(x, *p["out"], stride=1, pad=1, act="tanh", out_dtype=jnp.float32)
    return jnp.transpose(x, (0, 3, 1, 2))                        # NHWC -> NCHW


# ----------------------------------------------------------------------------
# Plain-JAX references (bf16 inputs, f32 accumulation) for numerical checks
# ----------------------------------------------------------------------------
def _ref_conv(x_nhwc, w_oihw, bias, stride, pad, relu=False):
    xb = x_nhwc.astype(jnp.bfloat16)
    wb = jnp.transpose(w_oihw, (2, 3, 1, 0)).astype(jnp.bfloat16)   # HWIO
    y = lax.conv_general_dilated(
        xb, wb, window_strides=(stride, stride),
        padding=((pad, pad), (pad, pad)),
        dimension_numbers=("NHWC", "HWIO", "NHWC"),
        preferred_element_type=jnp.float32) + bias
    return jnp.maximum(y, 0.0) if relu else y


def _ref_conv_transpose(x_nhwc, w_iohw, bias, relu=True):
    # ConvTranspose2d(k=4,s=2,p=1) == conv with lhs dilated by 2, padding 2,
    # spatially-flipped kernel with in/out channels swapped.
    xb = x_nhwc.astype(jnp.bfloat16)
    w = jnp.flip(w_iohw, axis=(2, 3))
    w_hwio = jnp.transpose(w, (2, 3, 0, 1)).astype(jnp.bfloat16)
    y = lax.conv_general_dilated(
        xb, w_hwio, window_strides=(1, 1),
        padding=((2, 2), (2, 2)), lhs_dilation=(2, 2),
        dimension_numbers=("NHWC", "HWIO", "NHWC"),
        preferred_element_type=jnp.float32) + bias
    return jnp.maximum(y, 0.0) if relu else y


def _ref_bn(y, gamma, beta, eps=_BN_EPS):
    mean = jnp.mean(y, axis=(0, 1, 2))
    var = jnp.mean(jnp.square(y - mean), axis=(0, 1, 2))
    return (y - mean) * (gamma * lax.rsqrt(var + eps)) + beta


def _ref_resblock(x_nhwc, p):
    h = _ref_conv(x_nhwc, p["w1"], p["b1"], 1, 1)
    h = jnp.maximum(_ref_bn(h, p["g1"], p["be1"]), 0.0)
    h = _ref_conv(h, p["w2"], p["b2"], 1, 1)
    h = _ref_bn(h, p["g2"], p["be2"])
    return h + x_nhwc


def _check_close(name, got, want, atol=6e-2, rtol=6e-2):
    got = jnp.asarray(got, jnp.float32)
    want = jnp.asarray(want, jnp.float32)
    ok = bool(jnp.allclose(got, want, atol=atol, rtol=rtol))
    err = float(jnp.max(jnp.abs(got - want)))
    assert ok, f"{name}: max abs err {err:.4f}"


if __name__ == "__main__":
    key = jax.random.PRNGKey(0)
    pkey, xkey, tkey = jax.random.split(key, 3)
    params = init_generator_params(pkey)

    # ---- unit checks against lax references (bf16-matched inputs) -----------
    t1, t2, t3 = jax.random.split(tkey, 3)
    # strided conv + relu
    xc = jax.random.normal(t1, (2, 16, 16, 3)).astype(jnp.bfloat16).astype(jnp.float32)
    w_e1, b_e1 = params["e1"]
    _check_close("conv2d",
                 conv2d(xc, w_e1, b_e1, stride=2, pad=1, act="relu"),
                 _ref_conv(xc, w_e1, b_e1, 2, 1, relu=True))
    # ConvTranspose2d parity decomposition
    xt = jax.random.normal(t2, (2, 4, 4, 64)).astype(jnp.bfloat16).astype(jnp.float32)
    w_t, b_t = _convT_params(jax.random.fold_in(tkey, 1), 64, 32, 4)
    _check_close("conv_transpose2d",
                 conv_transpose2d(xt, w_t, b_t, act="relu"),
                 _ref_conv_transpose(xt, w_t, b_t, relu=True))
    # fused conv+BN ResBlock
    xr = jax.random.normal(t3, (2, 8, 8, 64)).astype(jnp.bfloat16).astype(jnp.float32)
    _check_close("resblock", resblock(xr, params["r1"]),
                 _ref_resblock(xr, params["r1"]))

    # ---- full generator forward ---------------------------------------------
    x = jax.random.normal(xkey, (2, 3, 16, 16), jnp.float32)   # NCHW like PyTorch
    y = generator_forward(params, x)
    jax.block_until_ready(y)
    assert y.shape == (2, 3, 16, 16), y.shape
    assert bool(jnp.all(jnp.isfinite(y)))
    assert bool(jnp.all(jnp.abs(y) <= 1.0 + 1e-3))             # tanh output range
    print("KERNEL_OK")
</pallas_src>

<mosaic_0001>
module attributes {stable_mosaic.version = 11 : i64} {
  func.func @_mm_bias_act_kernel(%arg0: i32, %arg1: memref<128x128xbf16, #tpu.memory_space<vmem>>, %arg2: memref<128x64xbf16, #tpu.memory_space<vmem>>, %arg3: memref<1x64xf32, #tpu.memory_space<vmem>>, %arg4: memref<128x64xbf16, #tpu.memory_space<vmem>>) attributes {dimension_semantics = [#tpu.dimension_semantics<parallel>], iteration_bounds = array<i64: 1>, scalar_prefetch = 0 : i64, scratch_operands = 0 : i64, tpu.core_type = #tpu.core_type<tc>, window_params = [{transform_indices = @transform_0, window_bounds = array<i64: 128, 128>}, {pipeline_mode = #tpu.pipeline_mode<synchronous>, transform_indices = @transform_1, window_bounds = array<i64: 128, 64>}, {pipeline_mode = #tpu.pipeline_mode<synchronous>, transform_indices = @transform_2, window_bounds = array<i64: 1, 64>}, {transform_indices = @transform_3, window_bounds = array<i64: 128, 64>}]} {
    %c0 = arith.constant 0 : index
    %c0_0 = arith.constant 0 : index
    %0 = vector.load %arg1[%c0, %c0_0] : memref<128x128xbf16, #tpu.memory_space<vmem>>, vector<128x128xbf16>
    %c0_1 = arith.constant 0 : index
    %c0_2 = arith.constant 0 : index
    %1 = vector.load %arg2[%c0_1, %c0_2] : memref<128x64xbf16, #tpu.memory_space<vmem>>, vector<128x64xbf16>
    %cst = arith.constant dense<0.000000e+00> : vector<128x64xf32>
    %2 = tpu.matmul %0, %1, %cst {dimension_numbers = #tpu.dot_dimension_numbers<[1], [0], [0], [1], [0, 0, 1, 1], [], []>} : vector<128x128xbf16>, vector<128x64xbf16>, vector<128x64xf32> -> vector<128x64xf32>
    %c0_3 = arith.constant 0 : index
    %c0_4 = arith.constant 0 : index
    %3 = vector.load %arg3[%c0_3, %c0_4] : memref<1x64xf32, #tpu.memory_space<vmem>>, vector<1x64xf32>
    %4 = vector.broadcast %3 : vector<1x64xf32> to vector<128x64xf32>
    %5 = arith.addf %2, %4 : vector<128x64xf32>
    %cst_5 = arith.constant 0.000000e+00 : f32
    %6 = vector.broadcast %cst_5 : f32 to vector<128x64xf32>
    %7 = arith.maximumf %5, %6 : vector<128x64xf32>
    %8 = arith.truncf %7 : vector<128x64xf32> to vector<128x64xbf16>
    %c0_6 = arith.constant 0 : index
    %c0_7 = arith.constant 0 : index
    %9 = vector.load %arg4[%c0_6, %c0_7] : memref<128x64xbf16, #tpu.memory_space<vmem>>, vector<128x64xbf16>
    tpu.vector_store %arg4[%c0_6, %c0_7], %8 {strides = array<i32>} : memref<128x64xbf16, #tpu.memory_space<vmem>>, vector<128x64xbf16>,
    return
  }
  func.func @transform_0(%arg0: i32) -> (i32, i32) {
    %c0_i32 = arith.constant 0 : i32
    %c0_i32_0 = arith.constant 0 : i32
    return %arg0, %c0_i32 : i32, i32
  }
  func.func @transform_1(%arg0: i32) -> (i32, i32) {
    %c0_i32 = arith.constant 0 : i32
    %c0_i32_0 = arith.constant 0 : i32
    %c0_i32_1 = arith.constant 0 : i32
    return %c0_i32, %c0_i32_0 : i32, i32
  }
  func.func @transform_2(%arg0: i32) -> (i32, i32) {
    %c0_i32 = arith.constant 0 : i32
    %c0_i32_0 = arith.constant 0 : i32
    %c0_i32_1 = arith.constant 0 : i32
    return %c0_i32, %c0_i32_0 : i32, i32
  }
  func.func @transform_3(%arg0: i32) -> (i32, i32) {
    %c0_i32 = arith.constant 0 : i32
    %c0_i32_0 = arith.constant 0 : i32
    return %arg0, %c0_i32 : i32, i32
  }
}

</mosaic_0001>

<bundles_post_ra>
// kernel: tpu_custom_call.1
= control target key start
LH: loop header
LB: loop body
LE: loop exit
PB: predicated region body
PF: predicated region fallthrough
CT: control target
= control target key end

     0   :  { %vm227_vm0 = vcmask 519168   ;;  %s506_s1 = inlined_call_operand.vmem [shape: bf16[128,64], index: 1, kind: input, shape index: {}]   ;;  %s507_s2 = inlined_call_operand.vmem [shape: f32[1,64], index: 2, kind: input, shape index: {}]   ;;  %s508_s0 = inlined_call_operand.vmem [shape: bf16[128,128], index: 0, kind: input, shape index: {}]   ;;  %s509_s3 = inlined_call_operand.vmem [shape: bf16[128,64], index: 3, kind: output, shape index: {}]  }
   0x1   :  { %v327_v0 = vld [vmem:[%s506_s1 + $0x38] sm:$0xff]  ;;  %v326_v1 = vld [vmem:[%s506_s1 + $0x30] sm:$0xff]  ;;  %v325_v2 = vld [vmem:[%s506_s1 + $0x28] sm:$0xff] }
   0x2   :  { %146 = vmatpush.bf16.msra.mxu0 %v327_v0  ;;  %328 = vmatpush.bf16.msra.mxu1 %v327_v0  ;;  %v324_v3 = vld [vmem:[%s506_s1 + $0x20] sm:$0xff]  ;;  %v323_v4 = vld [vmem:[%s506_s1 + $0x18] sm:$0xff]  ;;  %v322_v5 = vld [vmem:[%s506_s1 + $0x10] sm:$0xff] }
   0x3   :  { %329 = vmatpush.bf16.msra.mxu2 %v327_v0  ;;  %330 = vmatpush.bf16.msra.mxu3 %v327_v0  ;;  %v321_v6 = vld [vmem:[%s506_s1 + $0x8] sm:$0xff]  ;;  %v320_v7 = vld [vmem:[%s506_s1] sm:$0xff]  ;;  %v314_v9 = vld [vmem:[%s508_s0 + $0x10] sm:$0xff] }
   0x4   :  { %v312_v8 = vld [vmem:[%s508_s0] sm:$0xff]  ;;  %v318_v11 = vld [vmem:[%s508_s0 + $0x30] sm:$0xff]  ;;  %v313_v12 = vld [vmem:[%s508_s0 + $0x8] sm:$0xff] }
   0x5   :  { %v316_v10 = vld [vmem:[%s508_s0 + $0x20] sm:$0xff]  ;;  %v315_v13 = vld [vmem:[%s508_s0 + $0x18] sm:$0xff]  ;;  %v317_v14 = vld [vmem:[%s508_s0 + $0x28] sm:$0xff] }
   0x6   :  { %147 = vmatpush.bf16.msra.mxu0 %v326_v1  ;;  %331 = vmatpush.bf16.msra.mxu1 %v326_v1  ;;  %v319_v15 = vld [vmem:[%s508_s0 + $0x38] sm:$0xff]  ;;  %v424_v16 = vld [vmem:[%s507_s2] ss:$0 sm:$0xff] }
   0x7   :  { %332 = vmatpush.bf16.msra.mxu2 %v326_v1  ;;  %333 = vmatpush.bf16.msra.mxu3 %v326_v1 }
   0xa   :  { %148 = vmatpush.bf16.msra.mxu0 %v325_v2  ;;  %334 = vmatpush.bf16.msra.mxu1 %v325_v2 }
   0xb   :  { %335 = vmatpush.bf16.msra.mxu2 %v325_v2  ;;  %336 = vmatpush.bf16.msra.mxu3 %v325_v2 }
   0xe   :  { %149 = vmatpush.bf16.msra.mxu0 %v324_v3  ;;  %337 = vmatpush.bf16.msra.mxu1 %v324_v3 }
   0xf   :  { %338 = vmatpush.bf16.msra.mxu2 %v324_v3  ;;  %339 = vmatpush.bf16.msra.mxu3 %v324_v3 }
  0x12   :  { %150 = vmatpush.bf16.msra.mxu0 %v323_v4  ;;  %340 = vmatpush.bf16.msra.mxu1 %v323_v4 }
  0x13   :  { %341 = vmatpush.bf16.msra.mxu2 %v323_v4  ;;  %342 = vmatpush.bf16.msra.mxu3 %v323_v4 }
  0x16   :  { %151 = vmatpush.bf16.msra.mxu0 %v322_v5  ;;  %343 = vmatpush.bf16.msra.mxu1 %v322_v5 }
  0x17   :  { %344 = vmatpush.bf16.msra.mxu2 %v322_v5  ;;  %345 = vmatpush.bf16.msra.mxu3 %v322_v5 }
  0x1a   :  { %152 = vmatpush.bf16.msra.mxu0 %v321_v6  ;;  %346 = vmatpush.bf16.msra.mxu1 %v321_v6 }
  0x1b   :  { %347 = vmatpush.bf16.msra.mxu2 %v321_v6  ;;  %348 = vmatpush.bf16.msra.mxu3 %v321_v6 }
  0x1e   :  { %153 = vmatpush.bf16.msra.mxu0 %v320_v7  ;;  %349 = vmatpush.bf16.msra.mxu1 %v320_v7 }
  0x1f   :  { %350 = vmatpush.bf16.msra.mxu2 %v320_v7  ;;  %351 = vmatpush.bf16.msra.mxu3 %v320_v7 }
  0x21   :  { %154 = vmatmul.bf16.vlgmr.msra.gmra.mxu0 %v312_v8  ;;  %164 = vmatmul.bf16.vlgmr.msra.gmra.mxu1 %v314_v9 }
  0x22   :  { %174 = vmatmul.bf16.vlgmr.msra.gmra.mxu2 %v316_v10  ;;  %184 = vmatmul.bf16.vlgmr.msra.gmra.mxu3 %v318_v11 }
  0x31   :  { %159 = vmatmul.bf16.gmra.mxu0 %v313_v12  ;;  %169 = vmatmul.bf16.gmra.mxu1 %v315_v13 }
  0x32   :  { %179 = vmatmul.bf16.gmra.mxu2 %v317_v14  ;;  %189 = vmatmul.bf16.gmra.mxu3 %v319_v15 }
  0x9e   :  { %v155_v17 = vpop.f32.mrf.mxu0  ;;  %v165_v18 = vpop.f32.mrf.mxu1 }
  0x9f   :  { %v156_v19 = vadd.f32 %v424_v16, %v155_v17  ;;  %v166_v20 = vadd.f32 %v424_v16, %v165_v18 }
  0xa1   :  { %v195_v21 = vmax.f32 %v156_v19, 0.0  ;;  %v199_v22 = vmax.f32 %v166_v20, 0.0 }
  0xa3   :  { %v211_v23 = vpack.c.bf16 %v195_v21, %v195_v21  ;;  %v215_v24 = vpack.c.bf16 %v199_v22, %v199_v22 }
  0xa5   :  { %228 = vst.msk [vmem:[%s509_s3] sm:$0xf] %vm227_vm0, %v211_v23  ;;  %v175_v25 = vpop.f32.mrf.mxu2  ;;  %v185_v26 = vpop.f32.mrf.mxu3 }
  0xa6   :  { %232 = vst.msk [vmem:[%s509_s3 + $0x10] sm:$0xf] %vm227_vm0, %v215_v24  ;;  %v176_v27 = vadd.f32 %v424_v16, %v175_v25  ;;  %v186_v28 = vadd.f32 %v424_v16, %v185_v26  ;;  %v157_v29 = vpop.f32.mrf.mxu0  ;;  %v167_v30 = vpop.f32.mrf.mxu1 }
  0xa7   :  { %v158_v31 = vadd.f32 %v424_v16, %v157_v29  ;;  %v168_v32 = vadd.f32 %v424_v16, %v167_v30 }
  0xa8   :  { %v203_v33 = vmax.f32 %v176_v27, 0.0  ;;  %v207_v34 = vmax.f32 %v186_v28, 0.0 }
  0xa9   :  { %v196_v35 = vmax.f32 %v158_v31, 0.0  ;;  %v200_v36 = vmax.f32 %v168_v32, 0.0 }
  0xaa   :  { %v219_v37 = vpack.c.bf16 %v203_v33, %v203_v33  ;;  %v223_v38 = vpack.c.bf16 %v207_v34, %v207_v34 }
  0xab   :  { %v212_v39 = vpack.c.bf16 %v196_v35, %v196_v35  ;;  %v216_v40 = vpack.c.bf16 %v200_v36, %v200_v36 }
  0xac   :  { %236 = vst.msk [vmem:[%s509_s3 + $0x20] sm:$0xf] %vm227_vm0, %v219_v37 }
  0xad   :  { %240 = vst.msk [vmem:[%s509_s3 + $0x30] sm:$0xf] %vm227_vm0, %v223_v38  ;;  %v177_v41 = vpop.f32.mrf.mxu2  ;;  %v187_v42 = vpop.f32.mrf.mxu3 }
  0xae   :  { %229 = vst.msk [vmem:[%s509_s3 + $0x4] sm:$0xf] %vm227_vm0, %v212_v39  ;;  %v178_v43 = vadd.f32 %v424_v16, %v177_v41  ;;  %v188_v44 = vadd.f32 %v424_v16, %v187_v42  ;;  %v160_v45 = vpop.f32.mrf.mxu0  ;;  %v170_v46 = vpop.f32.mrf.mxu1 }
  0xaf   :  { %233 = vst.msk [vmem:[%s509_s3 + $0x14] sm:$0xf] %vm227_vm0, %v216_v40  ;;  %v161_v47 = vadd.f32 %v424_v16, %v160_v45  ;;  %v171_v48 = vadd.f32 %v424_v16, %v170_v46 }
  0xb0   :  { %v204_v49 = vmax.f32 %v178_v43, 0.0  ;;  %v208_v50 = vmax.f32 %v188_v44, 0.0 }
  0xb1   :  { %v197_v51 = vmax.f32 %v161_v47, 0.0  ;;  %v201_v52 = vmax.f32 %v171_v48, 0.0 }
  0xb2   :  { %v220_v53 = vpack.c.bf16 %v204_v49, %v204_v49  ;;  %v224_v54 = vpack.c.bf16 %v208_v50, %v208_v50 }
  0xb3   :  { %v213_v55 = vpack.c.bf16 %v197_v51, %v197_v51  ;;  %v217_v56 = vpack.c.bf16 %v201_v52, %v201_v52 }
  0xb4   :  { %237 = vst.msk [vmem:[%s509_s3 + $0x24] sm:$0xf] %vm227_vm0, %v220_v53 }
  0xb5   :  { %241 = vst.msk [vmem:[%s509_s3 + $0x34] sm:$0xf] %vm227_vm0, %v224_v54  ;;  %v180_v57 = vpop.f32.mrf.mxu2  ;;  %v190_v58 = vpop.f32.mrf.mxu3 }
  0xb6   :  { %230 = vst.msk [vmem:[%s509_s3 + $0x8] sm:$0xf] %vm227_vm0, %v213_v55  ;;  %v181_v59 = vadd.f32 %v424_v16, %v180_v57  ;;  %v191_v60 = vadd.f32 %v424_v16, %v190_v58  ;;  %v162_v61 = vpop.f32.mrf.mxu0  ;;  %v172_v62 = vpop.f32.mrf.mxu1 }
  0xb7   :  { %234 = vst.msk [vmem:[%s509_s3 + $0x18] sm:$0xf] %vm227_vm0, %v217_v56  ;;  %v163_v63 = vadd.f32 %v424_v16, %v162_v61  ;;  %v173_v0 = vadd.f32 %v424_v16, %v172_v62 }
  0xb8   :  { %v205_v1 = vmax.f32 %v181_v59, 0.0  ;;  %v209_v2 = vmax.f32 %v191_v60, 0.0 }
  0xb9   :  { %v198_v3 = vmax.f32 %v163_v63, 0.0  ;;  %v202_v4 = vmax.f32 %v173_v0, 0.0 }
  0xba   :  { %v221_v5 = vpack.c.bf16 %v205_v1, %v205_v1  ;;  %v225_v6 = vpack.c.bf16 %v209_v2, %v209_v2 }
  0xbb   :  { %v214_v7 = vpack.c.bf16 %v198_v3, %v198_v3  ;;  %v218_v8 = vpack.c.bf16 %v202_v4, %v202_v4 }
  0xbc   :  { %238 = vst.msk [vmem:[%s509_s3 + $0x28] sm:$0xf] %vm227_vm0, %v221_v5 }
  0xbd   :  { %242 = vst.msk [vmem:[%s509_s3 + $0x38] sm:$0xf] %vm227_vm0, %v225_v6  ;;  %v182_v9 = vpop.f32.mrf.mxu2  ;;  %v192_v10 = vpop.f32.mrf.mxu3 }
  0xbe   :  { %231 = vst.msk [vmem:[%s509_s3 + $0xc] sm:$0xf] %vm227_vm0, %v214_v7  ;;  %v183_v11 = vadd.f32 %v424_v16, %v182_v9  ;;  %v193_v12 = vadd.f32 %v424_v16, %v192_v10 }
  0xbf   :  { %235 = vst.msk [vmem:[%s509_s3 + $0x1c] sm:$0xf] %vm227_vm0, %v218_v8 }
  0xc0   :  { %v206_v13 = vmax.f32 %v183_v11, 0.0  ;;  %v210_v14 = vmax.f32 %v193_v12, 0.0 }
  0xc2   :  { %v222_v15 = vpack.c.bf16 %v206_v13, %v206_v13  ;;  %v226_v17 = vpack.c.bf16 %v210_v14, %v210_v14 }
  0xc4   :  { %239 = vst.msk [vmem:[%s509_s3 + $0x2c] sm:$0xf] %vm227_vm0, %v222_v15 }
  0xc5   :  { %243 = vst.msk [vmem:[%s509_s3 + $0x3c] sm:$0xf] %vm227_vm0, %v226_v17 }

</bundles_post_ra>
